<compile_context>
chip_gen: v7x
topology: tpu7x:2x2x1
jax: 0.10.0
libtpu: 0.0.40
codegen_flags: <defaults>
</compile_context>

<pallas_src>
import functools

import jax
import jax.numpy as jnp
from jax.experimental import pallas as pl
from jax.experimental.pallas import tpu as pltpu


def _classifier_kernel(x_ref, w1_ref, b1_ref, w2_ref, b2_ref, o_ref):
    # Hidden layer: tanh(x @ W1 + b1)   (MXU matmul; tanh goes to the EUP slot)
    x = x_ref[...]
    h = jnp.dot(x, w1_ref[...], preferred_element_type=jnp.float32) + b1_ref[...]
    h = jnp.tanh(h)
    # Output layer: sigmoid(h @ W2 + b2)  (lane-dense padded class dim)
    logits = jnp.dot(h, w2_ref[...], preferred_element_type=jnp.float32) + b2_ref[...]
    o_ref[...] = jax.nn.sigmoid(logits).astype(o_ref.dtype)


def _round_up(x, m):
    return ((x + m - 1) // m) * m


@functools.partial(jax.jit, static_argnames=("batch_tile",))
def next_entity_classifier(features, w1, b1, w2, b2, *, batch_tile=512):
    """features: (..., H) f32; w1: (H, H); b1: (1, H); w2: (H, C); b2: (1, C)."""
    H = features.shape[-1]
    C = w2.shape[1]

    # Flatten arbitrary leading dims (PyTorch Linear semantics), restore below.
    lead_shape = features.shape[:-1]
    x2d = features.reshape(-1, H)
    B = x2d.shape[0]

    # ---- Wrapper-side layout plumbing -------------------------------------
    # Lane-dense class dim: pad C up to a multiple of 128 (sliced off below).
    Cp = _round_up(max(C, 128), 128)
    # Batch tile: sublane-aligned (multiple of 8), capped at batch_tile.
    TB = min(_round_up(batch_tile, 8), _round_up(B, 8))
    Bp = _round_up(B, TB)

    x_p = x2d if Bp == B else jnp.pad(x2d, ((0, Bp - B), (0, 0)))
    w2_p = w2 if Cp == C else jnp.pad(w2, ((0, 0), (0, Cp - C)))
    b2_p = b2 if Cp == C else jnp.pad(b2, ((0, 0), (0, Cp - C)))

    grid = (Bp // TB,)

    out = pl.pallas_call(
        _classifier_kernel,
        out_shape=jax.ShapeDtypeStruct((Bp, Cp), jnp.float32),
        grid=grid,
        in_specs=[
            # Batch-tiled activations (double-buffered by the pipeline).
            pl.BlockSpec((TB, H), lambda i: (i, 0)),
            # Weights / biases: constant index_map -> VMEM-resident across tiles.
            pl.BlockSpec((H, H), lambda i: (0, 0)),
            pl.BlockSpec((1, H), lambda i: (0, 0)),
            pl.BlockSpec((H, Cp), lambda i: (0, 0)),
            pl.BlockSpec((1, Cp), lambda i: (0, 0)),
        ],
        out_specs=pl.BlockSpec((TB, Cp), lambda i: (i, 0)),
        compiler_params=pltpu.CompilerParams(
            # No reduction axis -> megacore-shardable batch axis.
            dimension_semantics=("parallel",),
        ),
    )(x_p, w1, b1, w2_p, b2_p)

    # Strip batch / class padding, restore leading dims.
    return out[:B, :C].reshape(*lead_shape, C)


def reference(features, w1, b1, w2, b2):
    h = jnp.tanh(features @ w1 + b1)
    return jax.nn.sigmoid(h @ w2 + b2)


if __name__ == "__main__":
    # Module hyperparameters (small, consistent with the forward pass).
    batch = 64        # several batch tiles so the pipelined / parallel path runs
    input_size = 32   # H
    class_num = 16    # C

    key = jax.random.PRNGKey(0)
    k_x, k_w1, k_b1, k_w2, k_b2 = jax.random.split(key, 5)

    # Deterministic synthetic parameters (PyTorch Linear weight is (out, in));
    # stored pre-transposed as (in, out).
    features = jax.random.normal(k_x, (batch, input_size), dtype=jnp.float32)
    scale1 = 1.0 / jnp.sqrt(input_size)
    w1 = jax.random.uniform(k_w1, (input_size, input_size), jnp.float32,
                            -scale1, scale1)
    b1 = jax.random.uniform(k_b1, (1, input_size), jnp.float32, -scale1, scale1)
    w2 = jax.random.uniform(k_w2, (input_size, class_num), jnp.float32,
                            -scale1, scale1)
    b2 = jax.random.uniform(k_b2, (1, class_num), jnp.float32, -scale1, scale1)

    # Small batch tile for the demo so the grid has multiple programs.
    out = next_entity_classifier(features, w1, b1, w2, b2, batch_tile=16)
    out = jax.block_until_ready(out)

    ref = reference(features, w1, b1, w2, b2)
    assert out.shape == (batch, class_num)
    assert jnp.allclose(out, ref, atol=1e-5, rtol=1e-5), "mismatch vs reference"

    print("KERNEL_OK")
</pallas_src>

<mosaic_0001>
module attributes {stable_mosaic.version = 11 : i64} {
  func.func @_classifier_kernel(%arg0: i32, %arg1: memref<16x32xf32, #tpu.memory_space<vmem>>, %arg2: memref<32x32xf32, #tpu.memory_space<vmem>>, %arg3: memref<1x32xf32, #tpu.memory_space<vmem>>, %arg4: memref<32x128xf32, #tpu.memory_space<vmem>>, %arg5: memref<1x128xf32, #tpu.memory_space<vmem>>, %arg6: memref<16x128xf32, #tpu.memory_space<vmem>>) attributes {dimension_semantics = [#tpu.dimension_semantics<parallel>], iteration_bounds = array<i64: 4>, scalar_prefetch = 0 : i64, scratch_operands = 0 : i64, tpu.core_type = #tpu.core_type<tc>, window_params = [{transform_indices = @transform_0, window_bounds = array<i64: 16, 32>}, {pipeline_mode = #tpu.pipeline_mode<synchronous>, transform_indices = @transform_1, window_bounds = array<i64: 32, 32>}, {pipeline_mode = #tpu.pipeline_mode<synchronous>, transform_indices = @transform_2, window_bounds = array<i64: 1, 32>}, {pipeline_mode = #tpu.pipeline_mode<synchronous>, transform_indices = @transform_3, window_bounds = array<i64: 32, 128>}, {pipeline_mode = #tpu.pipeline_mode<synchronous>, transform_indices = @transform_4, window_bounds = array<i64: 1, 128>}, {transform_indices = @transform_5, window_bounds = array<i64: 16, 128>}]} {
    %c0 = arith.constant 0 : index
    %c0_0 = arith.constant 0 : index
    %0 = vector.load %arg1[%c0, %c0_0] : memref<16x32xf32, #tpu.memory_space<vmem>>, vector<16x32xf32>
    %c0_1 = arith.constant 0 : index
    %c0_2 = arith.constant 0 : index
    %1 = vector.load %arg2[%c0_1, %c0_2] : memref<32x32xf32, #tpu.memory_space<vmem>>, vector<32x32xf32>
    %cst = arith.constant dense<0.000000e+00> : vector<16x32xf32>
    %2 = tpu.matmul %0, %1, %cst {dimension_numbers = #tpu.dot_dimension_numbers<[1], [0], [0], [1], [0, 0, 1, 1], [], []>} : vector<16x32xf32>, vector<32x32xf32>, vector<16x32xf32> -> vector<16x32xf32>
    %c0_3 = arith.constant 0 : index
    %c0_4 = arith.constant 0 : index
    %3 = vector.load %arg3[%c0_3, %c0_4] : memref<1x32xf32, #tpu.memory_space<vmem>>, vector<1x32xf32>
    %4 = vector.broadcast %3 : vector<1x32xf32> to vector<16x32xf32>
    %5 = arith.addf %2, %4 : vector<16x32xf32>
    %6 = math.tanh %5 : vector<16x32xf32>
    %c0_5 = arith.constant 0 : index
    %c0_6 = arith.constant 0 : index
    %7 = vector.load %arg4[%c0_5, %c0_6] : memref<32x128xf32, #tpu.memory_space<vmem>>, vector<32x128xf32>
    %cst_7 = arith.constant dense<0.000000e+00> : vector<16x128xf32>
    %8 = tpu.matmul %6, %7, %cst_7 {dimension_numbers = #tpu.dot_dimension_numbers<[1], [0], [0], [1], [0, 0, 1, 1], [], []>} : vector<16x32xf32>, vector<32x128xf32>, vector<16x128xf32> -> vector<16x128xf32>
    %c0_8 = arith.constant 0 : index
    %c0_9 = arith.constant 0 : index
    %9 = vector.load %arg5[%c0_8, %c0_9] : memref<1x128xf32, #tpu.memory_space<vmem>>, vector<1x128xf32>
    %10 = vector.broadcast %9 : vector<1x128xf32> to vector<16x128xf32>
    %11 = arith.addf %8, %10 : vector<16x128xf32>
    %12 = arith.negf %11 : vector<16x128xf32>
    %13 = math.exp %12 : vector<16x128xf32>
    %cst_10 = arith.constant 1.000000e+00 : f32
    %14 = vector.broadcast %cst_10 : f32 to vector<16x128xf32>
    %15 = arith.addf %14, %13 : vector<16x128xf32>
    %16 = arith.divf %14, %15 : vector<16x128xf32>
    %c0_11 = arith.constant 0 : index
    %c0_12 = arith.constant 0 : index
    %17 = vector.load %arg6[%c0_11, %c0_12] : memref<16x128xf32, #tpu.memory_space<vmem>>, vector<16x128xf32>
    tpu.vector_store %arg6[%c0_11, %c0_12], %16 {strides = array<i32>} : memref<16x128xf32, #tpu.memory_space<vmem>>, vector<16x128xf32>,
    return
  }
  func.func @transform_0(%arg0: i32) -> (i32, i32) {
    %c0_i32 = arith.constant 0 : i32
    %c0_i32_0 = arith.constant 0 : i32
    return %arg0, %c0_i32 : i32, i32
  }
  func.func @transform_1(%arg0: i32) -> (i32, i32) {
    %c0_i32 = arith.constant 0 : i32
    %c0_i32_0 = arith.constant 0 : i32
    %c0_i32_1 = arith.constant 0 : i32
    return %c0_i32, %c0_i32_0 : i32, i32
  }
  func.func @transform_2(%arg0: i32) -> (i32, i32) {
    %c0_i32 = arith.constant 0 : i32
    %c0_i32_0 = arith.constant 0 : i32
    %c0_i32_1 = arith.constant 0 : i32
    return %c0_i32, %c0_i32_0 : i32, i32
  }
  func.func @transform_3(%arg0: i32) -> (i32, i32) {
    %c0_i32 = arith.constant 0 : i32
    %c0_i32_0 = arith.constant 0 : i32
    %c0_i32_1 = arith.constant 0 : i32
    return %c0_i32, %c0_i32_0 : i32, i32
  }
  func.func @transform_4(%arg0: i32) -> (i32, i32) {
    %c0_i32 = arith.constant 0 : i32
    %c0_i32_0 = arith.constant 0 : i32
    %c0_i32_1 = arith.constant 0 : i32
    return %c0_i32, %c0_i32_0 : i32, i32
  }
  func.func @transform_5(%arg0: i32) -> (i32, i32) {
    %c0_i32 = arith.constant 0 : i32
    %c0_i32_0 = arith.constant 0 : i32
    return %arg0, %c0_i32 : i32, i32
  }
}

</mosaic_0001>

<bundles_post_ra>
// kernel: next_entity_classifier.1
= control target key start
LH: loop header
LB: loop body
LE: loop exit
PB: predicated region body
PF: predicated region fallthrough
CT: control target
= control target key end

     0   :  { %s614_s18 = smov 0   ;;  %s672_s0 = inlined_call_operand.vmem [shape: f32[64,32], index: 0, kind: input, shape index: {}]   ;;  %s673_s1 = inlined_call_operand.vmem [shape: f32[32,32], index: 1, kind: input, shape index: {}]   ;;  %s674_s2 = inlined_call_operand.vmem [shape: f32[1,32], index: 2, kind: input, shape index: {}]   ;;  %s675_s3 = inlined_call_operand.vmem [shape: f32[32,128], index: 3, kind: input, shape index: {}]   ;;  %s676_s4 = inlined_call_operand.vmem [shape: f32[1,128], index: 4, kind: input, shape index: {}]   ;;  %s677_s5 = inlined_call_operand.vmem [shape: f32[64,128], index: 5, kind: output, shape index: {}]  }
   0x1 LB: > { %s487_s19 = sadd.s32 4294967295, %s582_s18   ;;  %p491_p0 = scmp.ge.s32.totalorder %s582_s18, 1  ;;  %s582_s18 = sphi %s614_s18, %s15_s18  }
   0x2   : > { %p188_p1 = scmp.lt.s32.totalorder %s582_s18, 5 }
   0x4   : > { %p189_p2 = pnand %p491_p0, %p188_p1 }
   0x5   : > { %v230_v0 = vld [vmem:[%s673_s1] sm:$0xff] (!%p189_p2)  ;;  %v231_v1 = vld [vmem:[%s673_s1 + $0x8] sm:$0xff] (!%p189_p2)  ;;  %v232_v2 = vld [vmem:[%s673_s1 + $0x10] sm:$0xff] (!%p189_p2)  ;;  %s492_s26 = sshll.u32 (!%p189_p2), %s487_s19, 1  ;;  %vm241_vm0 = vcmask (!%p189_p2), 261120  }
   0x6   : > { %192 = sbr.rel (%p189_p2) target bundleno = 488 (0x1e8), region = 40  ;;  %v540_v3 = vpack.c.bf16 (!%p189_p2), %v231_v1, %v230_v0  ;;  %v233_v4 = vld [vmem:[%s673_s1 + $0x18] sm:$0xff] (!%p189_p2)  ;;  %p217_p3 = scmp.lt.s32.totalorder (!%p189_p2), %s492_s26, 7  ;;  %v325_v8 = vld [vmem:[%s675_s3] sm:$0xff] (!%p189_p2)  ;;  %v326_v9 = vld [vmem:[%s675_s3 + $0x8] sm:$0xff] (!%p189_p2) }
   0x7   : > { %v544_v5 = vpack.c.bf16 (!%p189_p2), %v233_v4, %v232_v2  ;;  %v327_v10 = vld [vmem:[%s675_s3 + $0x10] sm:$0xff] (!%p189_p2)  ;;  %v548_v11 = vpack.c.bf16 (!%p189_p2), %v326_v9, %v325_v8  ;;  %v328_v12 = vld [vmem:[%s675_s3 + $0x18] sm:$0xff] (!%p189_p2)  ;;  %v496_v14 = vld [vmem:[%s674_s2] ss:$0 sm:$0xff] (!%p189_p2) }
   0x8   : > { %541 = vmatprep.subr.bf16.mxu0 (!%p189_p2), %v540_v3  ;;  %v552_v13 = vpack.c.bf16 (!%p189_p2), %v328_v12, %v327_v10  ;;  %v499_v21 = vld [vmem:[%s676_s4] ss:$0 sm:$0xff] (!%p189_p2) }
   0x9   : > { %543 = vmatpush3.bf16.msra.mxu0 (!%p189_p2), %v540_v3  ;;  %549 = vmatprep.subr.bf16.mxu1 (!%p189_p2), %v548_v11 }
   0xa   : > { %545 = vmatprep.subr.bf16.mxu0 (!%p189_p2), %v544_v5  ;;  %551 = vmatpush3.bf16.msra.mxu1 (!%p189_p2), %v548_v11 }
   0xb   : > { %553 = vmatprep.subr.bf16.mxu1 (!%p189_p2), %v552_v13 }
   0xd   : > { %s679_s26 = smov (!%p217_p3, %s492_s26), 7  ;;  %547 = vmatpush3.bf16.msra.mxu0 %v544_v5 }
   0xe   : > { %s493_s29 = sshll.u32 %s679_s26, 3  ;;  %555 = vmatpush3.bf16.msra.mxu1 %v552_v13 }
   0xf   : > { %s220_s7 = scalar_lea.vmem %s672_s0, %s493_s29  ;;  %s226_s23 = scalar_lea.vmem %s677_s5, %s493_s29 }
  0x10   : > { %v228_v6 = vld [vmem:[%s220_s7] sm:$0xff]  ;;  %v229_v7 = vld [vmem:[%s220_s7 + $0x8] sm:$0xff] }
  0x11   : > { %526 = vmatprep.mubr.msk.f32.mxu0 %vm241_vm0, %v228_v6 }
  0x12   : > { %527 = vmatmul.mubr.msk.f32.vlgmr.msra.gmra.mrb[0].mxu0 %vm241_vm0, %v229_v7 }
  0xe5   : > { %v528_v15 = vpop.f32.mrb[0].mxu0 }
  0xe6   : > { %v320_v16 = vadd.f32 %v528_v15, %v496_v14  ;;  %v314_v17 = vpop.f32.mrb[1].mxu0 }
  0xe7   : > { %v315_v18 = vadd.f32 %v496_v14, %v314_v17 }
  0xe9   : > { %564 = vtanh.f32 %v315_v18 }
  0xea   : > { %566 = vtanh.f32 %v320_v16 }
  0xf3   : > { %v565_v19 = vpop.eup %564 }
  0xf4   : > { %v567_v20 = vpop.eup %566  ;;  %537 = vmatprep.mubr.msk.f32.mxu1 %vm241_vm0, %v565_v19 }
  0xf5   : > { %538 = vmatmul.mubr.msk.f32.vlgmr.msra.gmra.mrb[0].mxu1 %vm241_vm0, %v567_v20 }
 0x1c8   : > { %v539_v22 = vpop.f32.mrb[0].mxu1 }
 0x1c9   : > { %v414_v23 = vadd.f32 %v539_v22, %v499_v21  ;;  %v408_v24 = vpop.f32.mrb[1].mxu1 }
 0x1ca   : > { %v409_v25 = vadd.f32 %v499_v21, %v408_v24 }
 0x1cb   : > { %v503_v26 = vmul.f32 -1.442695, %v414_v23 }
 0x1cc   : > { %v502_v27 = vmul.f32 -1.442695, %v409_v25 }
 0x1cd   : > { %568 = vpow2.f32 %v503_v26 }
 0x1ce   : > { %570 = vpow2.f32 %v502_v27 }
 0x1d7   : > { %v569_v28 = vpop.eup %568 }
 0x1d8   : > { %v571_v29 = vpop.eup %570  ;;  %v424_v30 = vadd.f32 1.0, %v569_v28 }
 0x1d9   : > { %v423_v31 = vadd.f32 1.0, %v571_v29 }
 0x1db   : > { %572 = vrcp.f32 %v423_v31 }
 0x1dc   : > { %574 = vrcp.f32 %v424_v30 }
 0x1e5   : > { %v573_v32 = vpop.eup %572 }
 0x1e6   : > { %v575_v33 = vpop.eup %574  ;;  %429 = vst [vmem:[%s226_s23] sm:$0xff] %v573_v32 }
 0x1e7   : > { %430 = vst [vmem:[%s226_s23 + $0x8] sm:$0xff] %v575_v33 }
 0x1e8 PF: > { %s15_s18 = sadd.s32 1, %s582_s18  }
 0x1e9   : > { %p12_p4 = scmp.ge.s32.totalorder %s15_s18, 6  }
 0x1eb   :  { %14 = sbr.rel (!%p12_p4) target bundleno = 1 (0x1), region = 70 }

</bundles_post_ra>
